<compile_context>
chip_gen: v6e
topology: v6e:2x2x1
jax: 0.10.0
libtpu: 0.0.40
codegen_flags: <defaults>
</compile_context>

<pallas_src>
import functools

import jax
import jax.numpy as jnp
from jax import lax
from jax.experimental import pallas as pl
from jax.experimental.pallas import tpu as pltpu

LANE = 128  # TPU lane width; fused-head output is padded to this


def _round_up(n, m):
    return (n + m - 1) // m * m


def _pick_tile_b(batch):
    """Batch tile: sublane-aligned, big enough to amortize per-step overhead,
    >= 2 balanced grid steps when the batch allows it (both v7x TensorCores),
    and divisor-friendly so jnp.pad copies of x stay absent or tiny."""
    b8 = _round_up(max(batch, 1), 8)
    if b8 <= 16:
        return b8                                        # single full tile
    if b8 <= 4096:
        return min(b8, _round_up((b8 + 1) // 2, 16))     # two balanced steps
    # large batch: big tile that minimizes padding (ties -> bigger tile)
    return min((2048, 1024, 512, 256),
               key=lambda c: (_round_up(b8, c) - b8, -c))


def mdn_kernel(x_ref,
               w1_ref, s1_ref,
               w2_ref, s2_ref,
               w3_ref, s3_ref,
               wh_ref, bh_ref,
               out_ref,
               *, num_mixtures, k_total):
    """One batch tile: trunk (3x folded fc+bn+relu) + fused pi/mu/sigma heads."""

    def layer(h, w_ref, s_ref):
        # BN (eval) already folded into w (column-scaled) and s (bias+shift).
        y = jnp.dot(h.astype(jnp.bfloat16), w_ref[...],
                    preferred_element_type=jnp.float32)
        return jnp.maximum(y + s_ref[...], 0.0)

    h = layer(x_ref[...], w1_ref, s1_ref)   # x already bf16 (cast in wrapper)
    h = layer(h, w2_ref, s2_ref)
    h = layer(h, w3_ref, s3_ref)
    # dropout: identity in eval mode

    # Fused heads: one lane-dense matmul; lanes are [pi | mu | sigma | pad0].
    y = jnp.dot(h.astype(jnp.bfloat16), wh_ref[...],
                preferred_element_type=jnp.float32) + bh_ref[...]

    lane = lax.broadcasted_iota(jnp.int32, y.shape, 1)
    pi_mask = lane < num_mixtures
    sg_mask = (lane >= num_mixtures + k_total) & (lane < num_mixtures + 2 * k_total)

    # Row max over the pi lanes only (stable softmax).
    m = jnp.max(jnp.where(pi_mask, y, -jnp.inf), axis=1, keepdims=True)

    # Single exp over the whole slab (EUP is one port -- don't run it twice):
    # exponent = y - m on pi lanes, y on sigma lanes, 0 elsewhere.  Masking is
    # done BEFORE the exp so non-pi lanes can never overflow.
    z = jnp.where(pi_mask, y - m, jnp.where(sg_mask, y, 0.0))
    e = jnp.exp(z)

    denom = jnp.sum(jnp.where(pi_mask, e, 0.0), axis=1, keepdims=True)
    inv = 1.0 / denom          # exact divide; only (tile_b, 1) values -> cheap
    out = jnp.where(pi_mask, e * inv, jnp.where(sg_mask, e, y))
    out_ref[...] = out.astype(out_ref.dtype)


def mdn_forward(x, params, num_mixtures, output_dim=1, tile_b=None,
                out_dtype=jnp.bfloat16):
    B, input_dim = x.shape
    K = num_mixtures * output_dim
    assert num_mixtures + 2 * K <= LANE, "fused head must fit in one lane slab"

    if tile_b is None:
        tile_b = _pick_tile_b(B)
    tile_b = max(8, _round_up(tile_b, 8))
    Bp = _round_up(B, tile_b)

    # Halve the x DMA bytes: cast once here (pad after the cast, if needed).
    x = x.astype(jnp.bfloat16)
    if Bp != B:
        x = jnp.pad(x, ((0, Bp - B), (0, 0)))

    # ---- offline parameter prep (BN fold + head fusion + bf16 cast) ----
    def fold(w, b, scale, shift):
        wf = (w * scale).astype(jnp.bfloat16)           # column-scaled weight
        sh = (b * scale + shift).astype(jnp.float32)    # merged bias + shift
        return wf, sh

    w1, s1 = fold(params["w1"], params["b1"], params["s1"], params["t1"])
    w2, s2 = fold(params["w2"], params["b2"], params["s2"], params["t2"])
    w3, s3 = fold(params["w3"], params["b3"], params["s3"], params["t3"])

    wh = jnp.concatenate([params["wpi"], params["wmu"], params["wsg"]], axis=1)
    bh = jnp.concatenate([params["bpi"], params["bmu"], params["bsg"]], axis=1)
    pad = LANE - wh.shape[1]
    wh = jnp.pad(wh, ((0, 0), (0, pad))).astype(jnp.bfloat16)
    bh = jnp.pad(bh, ((0, 0), (0, pad))).astype(jnp.float32)

    kernel = functools.partial(mdn_kernel, num_mixtures=num_mixtures, k_total=K)

    def resident(shape):   # same block every grid step -> stays in VMEM
        return pl.BlockSpec(shape, lambda i: (0, 0))

    out = pl.pallas_call(
        kernel,
        out_shape=jax.ShapeDtypeStruct((Bp, LANE), out_dtype),
        grid=(Bp // tile_b,),
        in_specs=[
            pl.BlockSpec((tile_b, input_dim), lambda i: (i, 0)),
            resident(w1.shape), resident(s1.shape),
            resident(w2.shape), resident(s2.shape),
            resident(w3.shape), resident(s3.shape),
            resident(wh.shape), resident(bh.shape),
        ],
        out_specs=pl.BlockSpec((tile_b, LANE), lambda i: (i, 0)),
        compiler_params=pltpu.CompilerParams(
            dimension_semantics=("parallel",),
        ),
    )(x, w1, s1, w2, s2, w3, s3, wh, bh)

    out = out[:B].astype(jnp.float32)
    pi = out[:, :num_mixtures]
    mu = out[:, num_mixtures:num_mixtures + K].reshape(B, num_mixtures, output_dim)
    sigma = out[:, num_mixtures + K:num_mixtures + 2 * K].reshape(
        B, num_mixtures, output_dim)
    return pi, mu, sigma


def mdn_reference(x, params, num_mixtures, output_dim=1):
    """Pure-JAX eval-mode reference mirroring the kernel's precision path
    (bf16 matmul operands, f32 accumulation and elementwise math)."""
    def dot(a, b):
        return jnp.dot(a.astype(jnp.bfloat16), b.astype(jnp.bfloat16),
                       preferred_element_type=jnp.float32)

    def trunk(h, w, b, s, t):
        y = dot(h, w) + b
        y = y * s + t                 # eval-mode BatchNorm affine
        return jnp.maximum(y, 0.0)

    h = trunk(x, params["w1"], params["b1"], params["s1"], params["t1"])
    h = trunk(h, params["w2"], params["b2"], params["s2"], params["t2"])
    h = trunk(h, params["w3"], params["b3"], params["s3"], params["t3"])
    pi = jax.nn.softmax(dot(h, params["wpi"]) + params["bpi"], axis=1)
    mu = (dot(h, params["wmu"]) + params["bmu"]).reshape(
        -1, num_mixtures, output_dim)
    sigma = jnp.exp(dot(h, params["wsg"]) + params["bsg"]).reshape(
        -1, num_mixtures, output_dim)
    return pi, mu, sigma


def init_params(key, input_dim, hidden_dim, num_mixtures, output_dim=1, eps=1e-5):
    """Deterministic synthetic parameters; BN expressed as eval-mode (scale, shift)."""
    ks = jax.random.split(key, 16)

    def lin(kw, kb, d_in, d_out):
        w = jax.random.normal(kw, (d_in, d_out), jnp.float32) * 0.1
        b = jax.random.normal(kb, (1, d_out), jnp.float32) * 0.1
        return w, b

    def bn(kg, kb, d):
        gamma = 1.0 + 0.1 * jax.random.normal(kg, (1, d), jnp.float32)
        beta = 0.1 * jax.random.normal(kb, (1, d), jnp.float32)
        running_mean = jnp.zeros((1, d), jnp.float32)   # fresh-module defaults
        running_var = jnp.ones((1, d), jnp.float32)
        scale = gamma / jnp.sqrt(running_var + eps)
        shift = beta - running_mean * scale
        return scale, shift

    K = num_mixtures * output_dim
    p = {}
    p["w1"], p["b1"] = lin(ks[0], ks[1], input_dim, hidden_dim)
    p["s1"], p["t1"] = bn(ks[2], ks[3], hidden_dim)
    p["w2"], p["b2"] = lin(ks[4], ks[5], hidden_dim, hidden_dim)
    p["s2"], p["t2"] = bn(ks[6], ks[7], hidden_dim)
    p["w3"], p["b3"] = lin(ks[8], ks[9], hidden_dim, hidden_dim)
    p["s3"], p["t3"] = bn(ks[10], ks[11], hidden_dim)
    p["wpi"], p["bpi"] = lin(ks[12], ks[13], hidden_dim, num_mixtures)
    p["wmu"], p["bmu"] = lin(ks[14], ks[15], hidden_dim, K)
    kw, kb = jax.random.split(jax.random.fold_in(key, 99))
    p["wsg"], p["bsg"] = lin(kw, kb, hidden_dim, K)
    return p


if __name__ == "__main__":
    batch = 8
    input_dim = 16
    hidden_dim = 256       # matches the PyTorch module's hidden_dim
    num_mixtures = 8
    output_dim = 1

    key = jax.random.PRNGKey(0)
    kx, kp = jax.random.split(key)
    x = jax.random.normal(kx, (batch, input_dim), jnp.float32)
    params = init_params(kp, input_dim, hidden_dim, num_mixtures, output_dim)

    pi, mu, sigma = mdn_forward(x, params, num_mixtures, output_dim)
    jax.block_until_ready((pi, mu, sigma))

    assert pi.shape == (batch, num_mixtures)
    assert mu.shape == (batch, num_mixtures, output_dim)
    assert sigma.shape == (batch, num_mixtures, output_dim)

    # softmax rows sum to 1 (exact divide in-kernel; bf16 output rounding only)
    assert bool(jnp.all(jnp.abs(jnp.sum(pi, axis=1) - 1.0) < 1e-2))
    assert bool(jnp.all(pi >= 0))
    assert bool(jnp.all(sigma > 0))

    # pure-JAX reference (same precision path) checks masking / fusion plumbing
    pi_r, mu_r, sg_r = mdn_reference(x, params, num_mixtures, output_dim)
    assert bool(jnp.allclose(pi, pi_r, atol=2e-2, rtol=2e-2))
    assert bool(jnp.allclose(mu, mu_r, atol=2e-2, rtol=2e-2))
    assert bool(jnp.allclose(sigma, sg_r, atol=2e-2, rtol=2e-2))

    print("KERNEL_OK")
</pallas_src>

<mosaic_0001>
module attributes {stable_mosaic.version = 11 : i64} {
  func.func @mdn_kernel(%arg0: i32, %arg1: memref<8x16xbf16, #tpu.memory_space<vmem>>, %arg2: memref<16x256xbf16, #tpu.memory_space<vmem>>, %arg3: memref<1x256xf32, #tpu.memory_space<vmem>>, %arg4: memref<256x256xbf16, #tpu.memory_space<vmem>>, %arg5: memref<1x256xf32, #tpu.memory_space<vmem>>, %arg6: memref<256x256xbf16, #tpu.memory_space<vmem>>, %arg7: memref<1x256xf32, #tpu.memory_space<vmem>>, %arg8: memref<256x128xbf16, #tpu.memory_space<vmem>>, %arg9: memref<1x128xf32, #tpu.memory_space<vmem>>, %arg10: memref<8x128xbf16, #tpu.memory_space<vmem>>) attributes {dimension_semantics = [#tpu.dimension_semantics<parallel>], iteration_bounds = array<i64: 1>, scalar_prefetch = 0 : i64, scratch_operands = 0 : i64, tpu.core_type = #tpu.core_type<tc>, window_params = [{transform_indices = @transform_0, window_bounds = array<i64: 8, 16>}, {pipeline_mode = #tpu.pipeline_mode<synchronous>, transform_indices = @transform_1, window_bounds = array<i64: 16, 256>}, {pipeline_mode = #tpu.pipeline_mode<synchronous>, transform_indices = @transform_2, window_bounds = array<i64: 1, 256>}, {pipeline_mode = #tpu.pipeline_mode<synchronous>, transform_indices = @transform_3, window_bounds = array<i64: 256, 256>}, {pipeline_mode = #tpu.pipeline_mode<synchronous>, transform_indices = @transform_4, window_bounds = array<i64: 1, 256>}, {pipeline_mode = #tpu.pipeline_mode<synchronous>, transform_indices = @transform_5, window_bounds = array<i64: 256, 256>}, {pipeline_mode = #tpu.pipeline_mode<synchronous>, transform_indices = @transform_6, window_bounds = array<i64: 1, 256>}, {pipeline_mode = #tpu.pipeline_mode<synchronous>, transform_indices = @transform_7, window_bounds = array<i64: 256, 128>}, {pipeline_mode = #tpu.pipeline_mode<synchronous>, transform_indices = @transform_8, window_bounds = array<i64: 1, 128>}, {transform_indices = @transform_9, window_bounds = array<i64: 8, 128>}]} {
    %c0 = arith.constant 0 : index
    %c0_0 = arith.constant 0 : index
    %0 = vector.load %arg1[%c0, %c0_0] : memref<8x16xbf16, #tpu.memory_space<vmem>>, vector<8x16xbf16>
    %c0_1 = arith.constant 0 : index
    %c0_2 = arith.constant 0 : index
    %1 = vector.load %arg2[%c0_1, %c0_2] : memref<16x256xbf16, #tpu.memory_space<vmem>>, vector<16x256xbf16>
    %cst = arith.constant dense<0.000000e+00> : vector<8x256xf32>
    %2 = tpu.matmul %0, %1, %cst {dimension_numbers = #tpu.dot_dimension_numbers<[1], [0], [0], [1], [0, 0, 1, 1], [], []>} : vector<8x16xbf16>, vector<16x256xbf16>, vector<8x256xf32> -> vector<8x256xf32>
    %c0_3 = arith.constant 0 : index
    %c0_4 = arith.constant 0 : index
    %3 = vector.load %arg3[%c0_3, %c0_4] : memref<1x256xf32, #tpu.memory_space<vmem>>, vector<1x256xf32>
    %4 = vector.broadcast %3 : vector<1x256xf32> to vector<8x256xf32>
    %5 = arith.addf %2, %4 : vector<8x256xf32>
    %cst_5 = arith.constant 0.000000e+00 : f32
    %6 = vector.broadcast %cst_5 : f32 to vector<8x256xf32>
    %7 = arith.maximumf %5, %6 : vector<8x256xf32>
    %8 = arith.truncf %7 : vector<8x256xf32> to vector<8x256xbf16>
    %c0_6 = arith.constant 0 : index
    %c0_7 = arith.constant 0 : index
    %9 = vector.load %arg4[%c0_6, %c0_7] : memref<256x256xbf16, #tpu.memory_space<vmem>>, vector<256x256xbf16>
    %cst_8 = arith.constant dense<0.000000e+00> : vector<8x256xf32>
    %10 = tpu.matmul %8, %9, %cst_8 {dimension_numbers = #tpu.dot_dimension_numbers<[1], [0], [0], [1], [0, 0, 1, 1], [], []>} : vector<8x256xbf16>, vector<256x256xbf16>, vector<8x256xf32> -> vector<8x256xf32>
    %c0_9 = arith.constant 0 : index
    %c0_10 = arith.constant 0 : index
    %11 = vector.load %arg5[%c0_9, %c0_10] : memref<1x256xf32, #tpu.memory_space<vmem>>, vector<1x256xf32>
    %12 = vector.broadcast %11 : vector<1x256xf32> to vector<8x256xf32>
    %13 = arith.addf %10, %12 : vector<8x256xf32>
    %cst_11 = arith.constant 0.000000e+00 : f32
    %14 = vector.broadcast %cst_11 : f32 to vector<8x256xf32>
    %15 = arith.maximumf %13, %14 : vector<8x256xf32>
    %16 = arith.truncf %15 : vector<8x256xf32> to vector<8x256xbf16>
    %c0_12 = arith.constant 0 : index
    %c0_13 = arith.constant 0 : index
    %17 = vector.load %arg6[%c0_12, %c0_13] : memref<256x256xbf16, #tpu.memory_space<vmem>>, vector<256x256xbf16>
    %cst_14 = arith.constant dense<0.000000e+00> : vector<8x256xf32>
    %18 = tpu.matmul %16, %17, %cst_14 {dimension_numbers = #tpu.dot_dimension_numbers<[1], [0], [0], [1], [0, 0, 1, 1], [], []>} : vector<8x256xbf16>, vector<256x256xbf16>, vector<8x256xf32> -> vector<8x256xf32>
    %c0_15 = arith.constant 0 : index
    %c0_16 = arith.constant 0 : index
    %19 = vector.load %arg7[%c0_15, %c0_16] : memref<1x256xf32, #tpu.memory_space<vmem>>, vector<1x256xf32>
    %20 = vector.broadcast %19 : vector<1x256xf32> to vector<8x256xf32>
    %21 = arith.addf %18, %20 : vector<8x256xf32>
    %cst_17 = arith.constant 0.000000e+00 : f32
    %22 = vector.broadcast %cst_17 : f32 to vector<8x256xf32>
    %23 = arith.maximumf %21, %22 : vector<8x256xf32>
    %24 = arith.truncf %23 : vector<8x256xf32> to vector<8x256xbf16>
    %c0_18 = arith.constant 0 : index
    %c0_19 = arith.constant 0 : index
    %25 = vector.load %arg8[%c0_18, %c0_19] : memref<256x128xbf16, #tpu.memory_space<vmem>>, vector<256x128xbf16>
    %cst_20 = arith.constant dense<0.000000e+00> : vector<8x128xf32>
    %26 = tpu.matmul %24, %25, %cst_20 {dimension_numbers = #tpu.dot_dimension_numbers<[1], [0], [0], [1], [0, 0, 1, 1], [], []>} : vector<8x256xbf16>, vector<256x128xbf16>, vector<8x128xf32> -> vector<8x128xf32>
    %c0_21 = arith.constant 0 : index
    %c0_22 = arith.constant 0 : index
    %27 = vector.load %arg9[%c0_21, %c0_22] : memref<1x128xf32, #tpu.memory_space<vmem>>, vector<1x128xf32>
    %28 = vector.broadcast %27 : vector<1x128xf32> to vector<8x128xf32>
    %29 = arith.addf %26, %28 : vector<8x128xf32>
    %30 = tpu.iota {dimensions = array<i32: 1>} : vector<8x128xi32>
    %c8_i32 = arith.constant 8 : i32
    %31 = vector.broadcast %c8_i32 : i32 to vector<8x128xi32>
    %32 = arith.cmpi slt, %30, %31 : vector<8x128xi32>
    %c16_i32 = arith.constant 16 : i32
    %33 = vector.broadcast %c16_i32 : i32 to vector<8x128xi32>
    %34 = arith.cmpi sge, %30, %33 : vector<8x128xi32>
    %c24_i32 = arith.constant 24 : i32
    %35 = vector.broadcast %c24_i32 : i32 to vector<8x128xi32>
    %36 = arith.cmpi slt, %30, %35 : vector<8x128xi32>
    %37 = arith.andi %34, %36 : vector<8x128xi1>
    %cst_23 = arith.constant 0xFF800000 : f32
    %38 = vector.broadcast %cst_23 : f32 to vector<8x128xf32>
    %39 = arith.select %32, %29, %38 : vector<8x128xi1>, vector<8x128xf32>
    %cst_24 = arith.constant dense<0xFF800000> : vector<8xf32>
    %40 = vector.multi_reduction <maximumf>, %39, %cst_24 [1] : vector<8x128xf32> to vector<8xf32>
    %41 = vector.shape_cast %40 : vector<8xf32> to vector<8x1xf32>
    %42 = vector.broadcast %41 : vector<8x1xf32> to vector<8x128xf32>
    %43 = arith.subf %29, %42 : vector<8x128xf32>
    %cst_25 = arith.constant 0.000000e+00 : f32
    %44 = vector.broadcast %cst_25 : f32 to vector<8x128xf32>
    %45 = arith.select %37, %29, %44 : vector<8x128xi1>, vector<8x128xf32>
    %46 = arith.select %32, %43, %45 : vector<8x128xi1>, vector<8x128xf32>
    %47 = math.exp %46 : vector<8x128xf32>
    %cst_26 = arith.constant 0.000000e+00 : f32
    %48 = vector.broadcast %cst_26 : f32 to vector<8x128xf32>
    %49 = arith.select %32, %47, %48 : vector<8x128xi1>, vector<8x128xf32>
    %cst_27 = arith.constant dense<0.000000e+00> : vector<8xf32>
    %50 = vector.multi_reduction <add>, %49, %cst_27 [1] : vector<8x128xf32> to vector<8xf32>
    %51 = vector.shape_cast %50 : vector<8xf32> to vector<8x1xf32>
    %cst_28 = arith.constant 1.000000e+00 : f32
    %52 = vector.broadcast %cst_28 : f32 to vector<8x1xf32>
    %53 = arith.divf %52, %51 : vector<8x1xf32>
    %54 = vector.broadcast %53 : vector<8x1xf32> to vector<8x128xf32>
    %55 = arith.mulf %47, %54 : vector<8x128xf32>
    %56 = arith.select %37, %47, %29 : vector<8x128xi1>, vector<8x128xf32>
    %57 = arith.select %32, %55, %56 : vector<8x128xi1>, vector<8x128xf32>
    %58 = arith.truncf %57 : vector<8x128xf32> to vector<8x128xbf16>
    %c0_29 = arith.constant 0 : index
    %c0_30 = arith.constant 0 : index
    %59 = vector.load %arg10[%c0_29, %c0_30] : memref<8x128xbf16, #tpu.memory_space<vmem>>, vector<8x128xbf16>
    tpu.vector_store %arg10[%c0_29, %c0_30], %58 {strides = array<i32>} : memref<8x128xbf16, #tpu.memory_space<vmem>>, vector<8x128xbf16>,
    return
  }
  func.func @transform_0(%arg0: i32) -> (i32, i32) {
    %c0_i32 = arith.constant 0 : i32
    %c0_i32_0 = arith.constant 0 : i32
    return %arg0, %c0_i32 : i32, i32
  }
  func.func @transform_1(%arg0: i32) -> (i32, i32) {
    %c0_i32 = arith.constant 0 : i32
    %c0_i32_0 = arith.constant 0 : i32
    %c0_i32_1 = arith.constant 0 : i32
    return %c0_i32, %c0_i32_0 : i32, i32
  }
  func.func @transform_2(%arg0: i32) -> (i32, i32) {
    %c0_i32 = arith.constant 0 : i32
    %c0_i32_0 = arith.constant 0 : i32
    %c0_i32_1 = arith.constant 0 : i32
    return %c0_i32, %c0_i32_0 : i32, i32
  }
  func.func @transform_3(%arg0: i32) -> (i32, i32) {
    %c0_i32 = arith.constant 0 : i32
    %c0_i32_0 = arith.constant 0 : i32
    %c0_i32_1 = arith.constant 0 : i32
    return %c0_i32, %c0_i32_0 : i32, i32
  }
  func.func @transform_4(%arg0: i32) -> (i32, i32) {
    %c0_i32 = arith.constant 0 : i32
    %c0_i32_0 = arith.constant 0 : i32
    %c0_i32_1 = arith.constant 0 : i32
    return %c0_i32, %c0_i32_0 : i32, i32
  }
  func.func @transform_5(%arg0: i32) -> (i32, i32) {
    %c0_i32 = arith.constant 0 : i32
    %c0_i32_0 = arith.constant 0 : i32
    %c0_i32_1 = arith.constant 0 : i32
    return %c0_i32, %c0_i32_0 : i32, i32
  }
  func.func @transform_6(%arg0: i32) -> (i32, i32) {
    %c0_i32 = arith.constant 0 : i32
    %c0_i32_0 = arith.constant 0 : i32
    %c0_i32_1 = arith.constant 0 : i32
    return %c0_i32, %c0_i32_0 : i32, i32
  }
  func.func @transform_7(%arg0: i32) -> (i32, i32) {
    %c0_i32 = arith.constant 0 : i32
    %c0_i32_0 = arith.constant 0 : i32
    %c0_i32_1 = arith.constant 0 : i32
    return %c0_i32, %c0_i32_0 : i32, i32
  }
  func.func @transform_8(%arg0: i32) -> (i32, i32) {
    %c0_i32 = arith.constant 0 : i32
    %c0_i32_0 = arith.constant 0 : i32
    %c0_i32_1 = arith.constant 0 : i32
    return %c0_i32, %c0_i32_0 : i32, i32
  }
  func.func @transform_9(%arg0: i32) -> (i32, i32) {
    %c0_i32 = arith.constant 0 : i32
    %c0_i32_0 = arith.constant 0 : i32
    return %arg0, %c0_i32 : i32, i32
  }
}

</mosaic_0001>

<bundles_post_ra>
// kernel: tpu_custom_call.1
= control target key start
LH: loop header
LB: loop body
LE: loop exit
PB: predicated region body
PF: predicated region fallthrough
CT: control target
= control target key end

     0   :  { %14 = vsyncpa [#allocation3], 0  ;;  %s1376_s0 = inlined_call_operand.hbm [shape: bf16[8,16], index: 0, kind: input, shape index: {}]   ;;  %s1377_s1 = inlined_call_operand.hbm [shape: bf16[16,256], index: 1, kind: input, shape index: {}]   ;;  %s1378_s2 = inlined_call_operand.vmem [shape: f32[1,256], index: 2, kind: input, shape index: {}]   ;;  %s1379_s3 = inlined_call_operand.hbm [shape: bf16[256,256], index: 3, kind: input, shape index: {}]   ;;  %s1380_s4 = inlined_call_operand.vmem [shape: f32[1,256], index: 4, kind: input, shape index: {}]   ;;  %s1381_s5 = inlined_call_operand.hbm [shape: bf16[256,256], index: 5, kind: input, shape index: {}]   ;;  %s1382_s6 = inlined_call_operand.vmem [shape: f32[1,256], index: 6, kind: input, shape index: {}]   ;;  %s1383_s7 = inlined_call_operand.hbm [shape: bf16[256,128], index: 7, kind: input, shape index: {}]   ;;  %s1384_s8 = inlined_call_operand.vmem [shape: f32[1,128], index: 8, kind: input, shape index: {}]   ;;  %s1385_s9 = inlined_call_operand.hbm [shape: bf16[8,128], index: 9, kind: output, shape index: {}]  }
   0x1   :  { %15 = vsyncpa [#allocation6], 0 }
   0x2   :  { %16 = vsyncpa [#allocation9], 0 }
   0x3   :  { %17 = vsyncpa [#allocation4], 0  ;;  %s1252_s30 = smov [#allocation5]  }
   0x4   :  { %s33_s10 = sshll.u32 %s1252_s30, 4  ;;  %s34_s10 = int_to_ptr.vmem [resolvable:$true] %s33_s10 }
   0x5   :  { %s1132_s11 = scalar_lea.vmem %s34_s10, 256  ;;  %p1137_p1 = scmp.lt.s32.totalorder %s34_s10, %s34_s10 }
   0x6   :  { %p1133_p0 = scmp.ne.s32.totalorder %s34_s10, %s1132_s11  ;;  %p1138_p2 = scmp.lt.s32.totalorder %s1132_s11, %s1132_s11 }
   0x8   :  { %p1139_p3 = por %p1138_p2, %p1137_p1 }
   0xa   :  { %p1140_p4 = pnand %p1139_p3, %p1133_p0 }
   0xc   :  { %1143 = shalt.err (!%p1140_p4)
}
   0xd   :  { %s1253_s12 = smov 128   ;;  %s1254_s13 = smov 8  }
   0xe   :  { %39 = dma.hbm_to_vmem [thread:$0]  %s1377_s1, 256, %s34_s10, [#allocation6], %s1253_s12, %s1253_s12, %s1254_s13  }
   0xf   :  { %s1255_s16 = smov [#allocation8]   ;;  %s1256_s18 = smov [#allocation2]  }
  0x10   :  { %s61_s17 = sshll.u32 %s1255_s16, 4  ;;  %s24_s19 = sshll.u32 %s1256_s18, 4  ;;  %s62_s17 = int_to_ptr.vmem [resolvable:$true] %s61_s17  ;;  %s25_s19 = int_to_ptr.vmem [resolvable:$true] %s24_s19 }
  0x11   :  { %s1152_s20 = scalar_lea.vmem %s62_s17, 4096  ;;  %p1157_p6 = scmp.lt.s32.totalorder %s62_s17, %s62_s17 }
  0x12   :  { %p1153_p5 = scmp.ne.s32.totalorder %s62_s17, %s1152_s20  ;;  %p1158_p7 = scmp.lt.s32.totalorder %s1152_s20, %s1152_s20 }
  0x14   :  { %p1159_p8 = por %p1158_p7, %p1157_p6 }
  0x16   :  { %p1160_p9 = pnand %p1159_p8, %p1153_p5 }
  0x18   :  { %1163 = shalt.err (!%p1160_p9)
}
  0x19   :  { %67 = dma.hbm_to_vmem [thread:$0]  %s1381_s5, 4096, %s62_s17, [#allocation9], %s1253_s12, %s1253_s12, %s1254_s13  }
  0x1a   :  { %s1172_s1 = scalar_lea.vmem %s25_s19, 64  ;;  %p1177_p11 = scmp.lt.s32.totalorder %s25_s19, %s25_s19 }
  0x1b   :  { %p1173_p10 = scmp.ne.s32.totalorder %s25_s19, %s1172_s1  ;;  %p1178_p12 = scmp.lt.s32.totalorder %s1172_s1, %s1172_s1 }
  0x1d   :  { %p1179_p13 = por %p1178_p12, %p1177_p11 }
  0x1f   :  { %p1180_p0 = pnand %p1179_p13, %p1173_p10 }
  0x21   :  { %1183 = shalt.err (!%p1180_p0)
}
  0x22   :  { %27 = dma.hbm_to_vmem [thread:$0]  %s1376_s0, 64, %s25_s19, [#allocation3]  }
  0x23   :  { %s1257_s25 = smov [#allocation7]   ;;  %s1258_s27 = smov [#allocation10]  }
  0x24   :  { %s47_s26 = sshll.u32 %s1257_s25, 4  ;;  %s75_s28 = sshll.u32 %s1258_s27, 4  ;;  %s48_s26 = int_to_ptr.vmem [resolvable:$true] %s47_s26  ;;  %s76_s28 = int_to_ptr.vmem [resolvable:$true] %s75_s28 }
  0x25   :  { %s1192_s29 = scalar_lea.vmem %s48_s26, 4096  ;;  %p1197_p2 = scmp.lt.s32.totalorder %s48_s26, %s48_s26 }
  0x26   :  { %p1193_p1 = scmp.ne.s32.totalorder %s48_s26, %s1192_s29  ;;  %p1198_p3 = scmp.lt.s32.totalorder %s1192_s29, %s1192_s29 }
  0x28   :  { %p1199_p4 = por %p1198_p3, %p1197_p2 }
  0x2a   :  { %p1200_p5 = pnand %p1199_p4, %p1193_p1 }
  0x2c   :  { %1203 = shalt.err (!%p1200_p5)
}
  0x2d   :  { %53 = dma.hbm_to_vmem [thread:$0]  %s1379_s3, 4096, %s48_s26, [#allocation6], %s1253_s12, %s1253_s12, %s1254_s13  }
  0x2e   :  { %s1212_s0 = scalar_lea.vmem %s76_s28, 2048  ;;  %p1217_p7 = scmp.lt.s32.totalorder %s76_s28, %s76_s28 }
  0x2f   :  { %p1213_p6 = scmp.ne.s32.totalorder %s76_s28, %s1212_s0  ;;  %p1218_p8 = scmp.lt.s32.totalorder %s1212_s0, %s1212_s0 }
  0x31   :  { %p1219_p9 = por %p1218_p8, %p1217_p7 }
  0x33   :  { %p1220_p10 = pnand %p1219_p9, %p1213_p6 }
  0x35   :  { %1223 = shalt.err (!%p1220_p10)
}
  0x36   :  { %s1259_s10 = smov 64   ;;  %s1260_s11 = smov 4  }
  0x37   :  { %81 = dma.hbm_to_vmem [thread:$0]  %s1383_s7, 2048, %s76_s28, [#allocation9], %s1259_s10, %s1259_s10, %s1260_s11  }
  0x38   :  { %1244 = dma.done.wait [#allocation3], 64  }
  0x39   :  { %1245 = vsyncadd [#allocation3], 4294967232 }
  0x3a   :  { %1246 = dma.done.wait [#allocation6], 4352  }
  0x3b   :  { %1247 = vsyncadd [#allocation6], 4294962944 }
  0x3c   :  { %1248 = dma.done.wait [#allocation9], 6144  }
  0x3d   :  { %1249 = vsyncadd [#allocation9], 4294961152  ;;  %v1261_v0 = vmov 0   ;;  %v1005_v1 = vld [vmem:[#allocation5 + $0x4] ss:$8 sps:$4 sm:$0xff]   ;;  %vm125_vm0 = vcmask 130048  }
  0x3e   :  { %161 = vmatprep.mubr.bf16.mxu0 %v1261_v0  ;;  %v1007_v2 = vld [vmem:[#allocation5] ss:$8 sps:$4 sm:$0xff]   ;;  %v100_v3 = vld [vmem:[#allocation2] sm:$0xf]  ;;  %143 = vmatprep.subr.bf16.mxu0 %v1005_v1  ;;  %v1008_v4 = vld [vmem:[#allocation7 + $0x74] ss:$8 sps:$4 sm:$0xff]   ;;  %v105_v0 = vlaneseq }
  0x3f   :  { %v1010_v5 = vld [vmem:[#allocation7 + $0x70] ss:$8 sps:$4 sm:$0xff]   ;;  %144 = vmatpush1.bf16.msra.mxu0 %v1007_v2  ;;  %v1011_v6 = vld [vmem:[#allocation7 + $0x64] ss:$8 sps:$4 sm:$0xff]   ;;  %378 = vmatprep.subr.bf16.mxu1 %v1008_v4  ;;  %v1013_v7 = vld [vmem:[#allocation7 + $0x60] ss:$8 sps:$4 sm:$0xff]  }
  0x40   :  { %379 = vmatpush1.bf16.msra.mxu1 %v1010_v5  ;;  %v1014_v8 = vld [vmem:[#allocation7 + $0x54] ss:$8 sps:$4 sm:$0xff]   ;;  %v1016_v9 = vld [vmem:[#allocation7 + $0x50] ss:$8 sps:$4 sm:$0xff]   ;;  %v1017_v10 = vld [vmem:[#allocation7 + $0x44] ss:$8 sps:$4 sm:$0xff]  }
  0x41   :  { %380 = vmatprep.subr.bf16.mxu1 %v1011_v6  ;;  %v1019_v11 = vld [vmem:[#allocation7 + $0x40] ss:$8 sps:$4 sm:$0xff]   ;;  %v1020_v12 = vld [vmem:[#allocation7 + $0x34] ss:$8 sps:$4 sm:$0xff]   ;;  %v1022_v13 = vld [vmem:[#allocation7 + $0x30] ss:$8 sps:$4 sm:$0xff]  }
  0x42   :  { %890 = vmatmul.mubr.msk.bf16.vlgmr.msra.gmra.mxu0 %vm125_vm0, %v100_v3  ;;  %v1023_v14 = vld [vmem:[#allocation7 + $0x24] ss:$8 sps:$4 sm:$0xff]   ;;  %v1025_v15 = vld [vmem:[#allocation7 + $0x20] ss:$8 sps:$4 sm:$0xff]   ;;  %v1026_v16 = vld [vmem:[#allocation7 + $0x14] ss:$8 sps:$4 sm:$0xff]  }
  0x43   :  { %v1028_v17 = vld [vmem:[#allocation7 + $0x10] ss:$8 sps:$4 sm:$0xff]   ;;  %v1029_v18 = vld [vmem:[#allocation7 + $0x4] ss:$8 sps:$4 sm:$0xff]   ;;  %v1031_v19 = vld [vmem:[#allocation7] ss:$8 sps:$4 sm:$0xff]  }
  0x44   :  { %381 = vmatpush1.bf16.msra.mxu1 %v1013_v7  ;;  %v1032_v20 = vld [vmem:[#allocation7 + $0xf4] ss:$8 sps:$4 sm:$0xff]   ;;  %v1034_v21 = vld [vmem:[#allocation7 + $0xf0] ss:$8 sps:$4 sm:$0xff]   ;;  %v1035_v22 = vld [vmem:[#allocation7 + $0xe4] ss:$8 sps:$4 sm:$0xff]  }
  0x45   :  { %382 = vmatprep.subr.bf16.mxu1 %v1014_v8  ;;  %v1037_v23 = vld [vmem:[#allocation7 + $0xe0] ss:$8 sps:$4 sm:$0xff]   ;;  %v1038_v24 = vld [vmem:[#allocation7 + $0xd4] ss:$8 sps:$4 sm:$0xff]   ;;  %v1040_v25 = vld [vmem:[#allocation7 + $0xd0] ss:$8 sps:$4 sm:$0xff]  }
  0x46   :  { %v1041_v26 = vld [vmem:[#allocation7 + $0xc4] ss:$8 sps:$4 sm:$0xff]   ;;  %v1043_v27 = vld [vmem:[#allocation7 + $0xc0] ss:$8 sps:$4 sm:$0xff]   ;;  %v1044_v28 = vld [vmem:[#allocation7 + $0xb4] ss:$8 sps:$4 sm:$0xff]  }
  0x47   :  { %v1046_v29 = vld [vmem:[#allocation7 + $0xb0] ss:$8 sps:$4 sm:$0xff]   ;;  %v1047_v30 = vld [vmem:[#allocation7 + $0xa4] ss:$8 sps:$4 sm:$0xff]   ;;  %v1049_v31 = vld [vmem:[#allocation7 + $0xa0] ss:$8 sps:$4 sm:$0xff]  }
  0x48   :  { %383 = vmatpush1.bf16.msra.mxu1 %v1016_v9  ;;  %v1050_v32 = vld [vmem:[#allocation7 + $0x94] ss:$8 sps:$4 sm:$0xff]   ;;  %v1052_v33 = vld [vmem:[#allocation7 + $0x90] ss:$8 sps:$4 sm:$0xff]   ;;  %v1053_v34 = vld [vmem:[#allocation7 + $0x84] ss:$8 sps:$4 sm:$0xff]  }
  0x49   :  { %384 = vmatprep.subr.bf16.mxu1 %v1017_v10  ;;  %v1055_v35 = vld [vmem:[#allocation7 + $0x80] ss:$8 sps:$4 sm:$0xff]   ;;  %v1056_v36 = vld [vmem:[#allocation8 + $0x70] ss:$8 sps:$4 sm:$0xff]   ;;  %v1058_v37 = vld [vmem:[#allocation8 + $0x74] ss:$8 sps:$4 sm:$0xff]  }
  0x4a   :  { %v1061_v38 = vld [vmem:[#allocation8 + $0x64] ss:$8 sps:$4 sm:$0xff]   ;;  %627 = vmatprep.subr.bf16.mxu0 %v1058_v37  ;;  %v1059_v39 = vld [vmem:[#allocation8 + $0x60] ss:$8 sps:$4 sm:$0xff]   ;;  %v1064_v40 = vld [vmem:[#allocation8 + $0x54] ss:$8 sps:$4 sm:$0xff]  }
  0x4b   :  { %628 = vmatpush1.bf16.msra.mxu0 %v1056_v36  ;;  %v1062_v41 = vld [vmem:[#allocation8 + $0x50] ss:$8 sps:$4 sm:$0xff]   ;;  %v1067_v42 = vld [vmem:[#allocation8 + $0x44] ss:$8 sps:$4 sm:$0xff]   ;;  %v1065_v43 = vld [vmem:[#allocation8 + $0x40] ss:$8 sps:$4 sm:$0xff]  }
  0x4c   :  { %385 = vmatpush1.bf16.msra.mxu1 %v1019_v11  ;;  %629 = vmatprep.subr.bf16.mxu0 %v1061_v38  ;;  %v1070_v44 = vld [vmem:[#allocation8 + $0x34] ss:$8 sps:$4 sm:$0xff]   ;;  %v1068_v45 = vld [vmem:[#allocation8 + $0x30] ss:$8 sps:$4 sm:$0xff]   ;;  %v1073_v46 = vld [vmem:[#allocation8 + $0x24] ss:$8 sps:$4 sm:$0xff]  }
  0x4d   :  { %386 = vmatprep.subr.bf16.mxu1 %v1020_v12  ;;  %v1071_v47 = vld [vmem:[#allocation8 + $0x20] ss:$8 sps:$4 sm:$0xff]   ;;  %v1076_v48 = vld [vmem:[#allocation8 + $0x14] ss:$8 sps:$4 sm:$0xff]   ;;  %v1074_v49 = vld [vmem:[#allocation8 + $0x10] ss:$8 sps:$4 sm:$0xff]  }
  0x4e   :  { %v1079_v50 = vld [vmem:[#allocation8 + $0x4] ss:$8 sps:$4 sm:$0xff]   ;;  %v1077_v51 = vld [vmem:[#allocation8] ss:$8 sps:$4 sm:$0xff]   ;;  %v1082_v52 = vld [vmem:[#allocation8 + $0xf4] ss:$8 sps:$4 sm:$0xff]  }
  0x4f   :  { %630 = vmatpush1.bf16.msra.mxu0 %v1059_v39  ;;  %v1080_v53 = vld [vmem:[#allocation8 + $0xf0] ss:$8 sps:$4 sm:$0xff]   ;;  %v1085_v54 = vld [vmem:[#allocation8 + $0xe4] ss:$8 sps:$4 sm:$0xff]   ;;  %v1083_v55 = vld [vmem:[#allocation8 + $0xe0] ss:$8 sps:$4 sm:$0xff]  }
  0x50   :  { %387 = vmatpush1.bf16.msra.mxu1 %v1022_v13  ;;  %631 = vmatprep.subr.bf16.mxu0 %v1064_v40  ;;  %v1088_v56 = vld [vmem:[#allocation8 + $0xd4] ss:$8 sps:$4 sm:$0xff]   ;;  %v1086_v57 = vld [vmem:[#allocation8 + $0xd0] ss:$8 sps:$4 sm:$0xff]   ;;  %v1091_v58 = vld [vmem:[#allocation8 + $0xc4] ss:$8 sps:$4 sm:$0xff]  }
  0x51   :  { %388 = vmatprep.subr.bf16.mxu1 %v1023_v14  ;;  %v1089_v59 = vld [vmem:[#allocation8 + $0xc0] ss:$8 sps:$4 sm:$0xff]   ;;  %v1094_v60 = vld [vmem:[#allocation8 + $0xb4] ss:$8 sps:$4 sm:$0xff]   ;;  %v1092_v61 = vld [vmem:[#allocation8 + $0xb0] ss:$8 sps:$4 sm:$0xff]  }
  0x52   :  { %v1097_v62 = vld [vmem:[#allocation8 + $0xa4] ss:$8 sps:$4 sm:$0xff]   ;;  %v1095_v63 = vld [vmem:[#allocation8 + $0xa0] ss:$8 sps:$4 sm:$0xff]   ;;  %v106_v1 = vshrl.u32 %v105_v0, 7 }
  0x53   :  { %632 = vmatpush1.bf16.msra.mxu0 %v1062_v41  ;;  %v103_v3 = vld [vmem:[%s1378_s2] sm:$0x3] }
  0x54   :  { %389 = vmatpush1.bf16.msra.mxu1 %v1025_v15  ;;  %633 = vmatprep.subr.bf16.mxu0 %v1067_v42  ;;  %v1338_v2 = vsub.s32 0, %v106_v1  ;;  %v1343_v4 = vsub.s32 1, %v106_v1  ;;  %v848_v1 = vand.u32 127, %v105_v0 }
  0x55   :  { %390 = vmatprep.subr.bf16.mxu1 %v1026_v16 }
  0x56   :  { %v108_v5 = vrot.slane %v103_v3, %v1338_v2  ;;  %v112_v6 = vrot.slane %v103_v3, %v1343_v4  ;;  %vm849_vm1 = vcmp.lt.s32.totalorder %v848_v1, 8  ;;  %vm850_vm2 = vcmp.ge.s32.totalorder %v848_v1, 16 }
  0x57   :  { %634 = vmatpush1.bf16.msra.mxu0 %v1065_v43  ;;  %vm851_vm3 = vcmp.lt.s32.totalorder %v848_v1, 24 }
  0x58   :  { %391 = vmatpush1.bf16.msra.mxu1 %v1028_v17  ;;  %635 = vmatprep.subr.bf16.mxu0 %v1070_v44  ;;  %v1100_v17 = vld [vmem:[#allocation8 + $0x94] ss:$8 sps:$4 sm:$0xff]   ;;  %vm1362_vm4 = vmand %vm850_vm2, %vm851_vm3 }
  0x59   :  { %392 = vmatprep.subr.bf16.mxu1 %v1029_v18  ;;  %v1098_v18 = vld [vmem:[#allocation8 + $0x90] ss:$8 sps:$4 sm:$0xff]  }
  0x5b   :  { %636 = vmatpush1.bf16.msra.mxu0 %v1068_v45 }
  0x5c   :  { %393 = vmatpush1.bf16.msra.mxu1 %v1031_v19  ;;  %637 = vmatprep.subr.bf16.mxu0 %v1073_v46  ;;  %v1103_v19 = vld [vmem:[#allocation8 + $0x84] ss:$8 sps:$4 sm:$0xff]  }
  0x5d   :  { %394 = vmatprep.subr.bf16.mxu1 %v1032_v20  ;;  %v1101_v20 = vld [vmem:[#allocation8 + $0x80] ss:$8 sps:$4 sm:$0xff]  }
  0x5e   :  { %v1116_v46 = vld [vmem:[#allocation10 + $0x48] sm:$0xff]  }
  0x5f   :  { %638 = vmatpush1.bf16.msra.mxu0 %v1071_v47  ;;  %v1117_v47 = vld [vmem:[#allocation10 + $0x8] sm:$0xff]  }
  0x60   :  { %395 = vmatpush2.bf16.msra.mxu1 %v1034_v21  ;;  %639 = vmatprep.subr.bf16.mxu0 %v1076_v48  ;;  %v1104_v21 = vld [vmem:[#allocation10 + $0x78] sm:$0xff]   ;;  %v1118_v48 = vld [vmem:[#allocation10 + $0x40] sm:$0xff]  }
  0x61   :  { %396 = vmatprep.subr.bf16.mxu1 %v1035_v22  ;;  %v1105_v22 = vld [vmem:[#allocation10 + $0x38] sm:$0xff]  }
  0x63   :  { %640 = vmatpush1.bf16.msra.mxu0 %v1074_v49  ;;  %v1119_v49 = vld [vmem:[#allocation10] sm:$0xff]  }
  0x64   :  { %397 = vmatpush2.bf16.msra.mxu1 %v1037_v23  ;;  %641 = vmatprep.subr.bf16.mxu0 %v1079_v50  ;;  %v1106_v23 = vld [vmem:[#allocation10 + $0x70] sm:$0xff]   ;;  %v455_v50 = vld [vmem:[%s1382_s6] sm:$0x3] }
  0x65   :  { %398 = vmatprep.subr.bf16.mxu1 %v1038_v24  ;;  %v1107_v24 = vld [vmem:[#allocation10 + $0x30] sm:$0xff]  }
  0x67   :  { %642 = vmatpush1.bf16.msra.mxu0 %v1077_v51  ;;  %v460_v51 = vrot.slane %v455_v50, %v1338_v2 }
  0x68   :  { %399 = vmatpush2.bf16.msra.mxu1 %v1040_v25  ;;  %643 = vmatprep.subr.bf16.mxu0 %v1082_v52  ;;  %v1108_v25 = vld [vmem:[#allocation10 + $0x68] sm:$0xff]   ;;  %v464_v52 = vrot.slane %v455_v50, %v1343_v4 }
  0x69   :  { %400 = vmatprep.subr.bf16.mxu1 %v1041_v26  ;;  %v1109_v26 = vld [vmem:[#allocation10 + $0x28] sm:$0xff]  }
  0x6b   :  { %644 = vmatpush2.bf16.msra.mxu0 %v1080_v53 }
  0x6c   :  { %401 = vmatpush2.bf16.msra.mxu1 %v1043_v27  ;;  %645 = vmatprep.subr.bf16.mxu0 %v1085_v54  ;;  %v1110_v27 = vld [vmem:[#allocation10 + $0x60] sm:$0xff]  }
  0x6d   :  { %402 = vmatprep.subr.bf16.mxu1 %v1044_v28  ;;  %v1111_v28 = vld [vmem:[#allocation10 + $0x20] sm:$0xff]  }
  0x6f   :  { %646 = vmatpush2.bf16.msra.mxu0 %v1083_v55 }
  0x70   :  { %403 = vmatpush2.bf16.msra.mxu1 %v1046_v29  ;;  %647 = vmatprep.subr.bf16.mxu0 %v1088_v56  ;;  %v1112_v29 = vld [vmem:[#allocation10 + $0x58] sm:$0xff]  }
  0x71   :  { %404 = vmatprep.subr.bf16.mxu1 %v1047_v30  ;;  %v1113_v30 = vld [vmem:[#allocation10 + $0x18] sm:$0xff]  }
  0x73   :  { %648 = vmatpush2.bf16.msra.mxu0 %v1086_v57 }
  0x74   :  { %405 = vmatpush2.bf16.msra.mxu1 %v1049_v31  ;;  %649 = vmatprep.subr.bf16.mxu0 %v1091_v58  ;;  %v1114_v31 = vld [vmem:[#allocation10 + $0x50] sm:$0xff]  }
  0x75   :  { %406 = vmatprep.subr.bf16.mxu1 %v1050_v32  ;;  %v1115_v32 = vld [vmem:[#allocation10 + $0x10] sm:$0xff]  }
  0x77   :  { %650 = vmatpush2.bf16.msra.mxu0 %v1089_v59 }
  0x78   :  { %407 = vmatpush2.bf16.msra.mxu1 %v1052_v33  ;;  %651 = vmatprep.subr.bf16.mxu0 %v1094_v60  ;;  %v206_v33 = vld [vmem:[%s1380_s4] sm:$0x3] }
  0x79   :  { %408 = vmatprep.subr.bf16.mxu1 %v1053_v34  ;;  %v211_v34 = vrot.slane %v206_v33, %v1338_v2  ;;  %v955_v2 = vld [vmem:[%s1384_s8] ss:$0 sm:$0xff]  ;;  %s1262_s8 = smov [#allocation11]  }
  0x7a   :  { %s877_s17 = sshll.u32 %s1262_s8, 4  ;;  %s878_s17 = int_to_ptr.vmem [resolvable:$true] %s877_s17 }
  0x7b   :  { %652 = vmatpush2.bf16.msra.mxu0 %v1092_v61  ;;  %s1224_s18 = scalar_lea.vmem %s878_s17, 64  ;;  %p1229_p12 = scmp.lt.s32.totalorder %s878_s17, %s878_s17 }
  0x7c   :  { %409 = vmatpush2.bf16.msra.mxu1 %v1055_v35  ;;  %653 = vmatprep.subr.bf16.mxu0 %v1097_v62  ;;  %v215_v35 = vrot.slane %v206_v33, %v1343_v4  ;;  %p1225_p11 = scmp.ne.s32.totalorder %s878_s17, %s1224_s18  ;;  %p1230_p13 = scmp.lt.s32.totalorder %s1224_s18, %s1224_s18 }
  0x7d   :  { %972 = vmatprep.subr.bf16.mxu1 %v1104_v21 }
  0x7e   :  { %p1231_p0 = por %p1230_p13, %p1229_p12 }
  0x7f   :  { %654 = vmatpush2.bf16.msra.mxu0 %v1095_v63 }
  0x80   :  { %655 = vmatprep.subr.bf16.mxu0 %v1100_v17  ;;  %p1232_p1 = pnand %p1231_p0, %p1225_p11 }
  0x83   :  { %656 = vmatpush2.bf16.msra.mxu0 %v1098_v18 }
  0x84   :  { %657 = vmatprep.subr.bf16.mxu0 %v1103_v19 }
  0x87   :  { %658 = vmatpush2.bf16.msra.mxu0 %v1101_v20 }
 0x102   :  { %v163_v7 = vpop.f32.mrf.mxu0 }
 0x103   :  { %v164_v8 = vadd.f32 %v163_v7, %v108_v5 }
 0x104   :  { %v165_v9 = vpop.f32.mrf.mxu0 }
 0x105   :  { %v166_v10 = vadd.f32 %v165_v9, %v112_v6  ;;  %v170_v11 = vmax.f32 %v164_v8, 0.0 }
 0x106   :  { %v167_v12 = vpop.f32.mrf.mxu0 }
 0x107   :  { %v171_v13 = vmax.f32 %v166_v10, 0.0  ;;  %v172_v16 = vpack.c.bf16 %v170_v11, %v170_v11 }
 0x108   :  { %v168_v14 = vpop.f32.mrf.mxu0 }
 0x109   :  { %v173_v15 = vpack.c.bf16 %v171_v13, %v171_v13 }
 0x10b   :  { %410 = vmatprep.mubr.bf16.mxu1 %v173_v15 }
 0x10c   :  { %411 = vmatmul.mubr.bf16.vlgmr.msra.gmra.mxu1 %v172_v16 }
 0x10d   :  { %973 = vmatpush3.bf16.msra.mxu1 %v1105_v22 }
 0x10e   :  { %974 = vmatprep.subr.bf16.mxu1 %v1106_v23 }
 0x111   :  { %975 = vmatpush3.bf16.msra.mxu1 %v1107_v24 }
 0x112   :  { %976 = vmatprep.subr.bf16.mxu1 %v1108_v25 }
 0x115   :  { %977 = vmatpush3.bf16.msra.mxu1 %v1109_v26 }
 0x116   :  { %978 = vmatprep.subr.bf16.mxu1 %v1110_v27 }
 0x119   :  { %979 = vmatpush3.bf16.msra.mxu1 %v1111_v28 }
 0x11a   :  { %980 = vmatprep.subr.bf16.mxu1 %v1112_v29 }
 0x11d   :  { %981 = vmatpush3.bf16.msra.mxu1 %v1113_v30 }
 0x11e   :  { %982 = vmatprep.subr.bf16.mxu1 %v1114_v31 }
 0x121   :  { %983 = vmatpush3.bf16.msra.mxu1 %v1115_v32 }
 0x122   :  { %984 = vmatprep.subr.bf16.mxu1 %v1116_v46 }
 0x125   :  { %985 = vmatpush3.bf16.msra.mxu1 %v1117_v47 }
 0x126   :  { %986 = vmatprep.subr.bf16.mxu1 %v1118_v48 }
 0x129   :  { %987 = vmatpush3.bf16.msra.mxu1 %v1119_v49 }
 0x1cc   :  { %v412_v36 = vpop.f32.mrf.mxu1 }
 0x1cd   :  { %v413_v37 = vadd.f32 %v412_v36, %v211_v34 }
 0x1ce   :  { %v414_v38 = vpop.f32.mrf.mxu1 }
 0x1cf   :  { %v415_v39 = vadd.f32 %v414_v38, %v215_v35  ;;  %v419_v40 = vmax.f32 %v413_v37, 0.0 }
 0x1d0   :  { %v416_v41 = vpop.f32.mrf.mxu1 }
 0x1d1   :  { %v420_v42 = vmax.f32 %v415_v39, 0.0  ;;  %v421_v45 = vpack.c.bf16 %v419_v40, %v419_v40 }
 0x1d2   :  { %v417_v43 = vpop.f32.mrf.mxu1 }
 0x1d3   :  { %v422_v44 = vpack.c.bf16 %v420_v42, %v420_v42 }
 0x1d5   :  { %659 = vmatprep.mubr.bf16.mxu0 %v422_v44 }
 0x1d6   :  { %660 = vmatmul.mubr.bf16.vlgmr.msra.gmra.mxu0 %v421_v45 }
 0x296   :  { %v661_v53 = vpop.f32.mrf.mxu0 }
 0x297   :  { %v662_v54 = vadd.f32 %v661_v53, %v460_v51 }
 0x298   :  { %v663_v55 = vpop.f32.mrf.mxu0 }
 0x299   :  { %v664_v56 = vadd.f32 %v663_v55, %v464_v52  ;;  %v668_v57 = vmax.f32 %v662_v54, 0.0 }
 0x29a   :  { %v665_v58 = vpop.f32.mrf.mxu0 }
 0x29b   :  { %v669_v59 = vmax.f32 %v664_v56, 0.0  ;;  %v670_v62 = vpack.c.bf16 %v668_v57, %v668_v57 }
 0x29c   :  { %v666_v60 = vpop.f32.mrf.mxu0 }
 0x29d   :  { %v671_v61 = vpack.c.bf16 %v669_v59, %v669_v59 }
 0x29f   :  { %839 = vmatprep.mubr.bf16.mxu1 %v671_v61 }
 0x2a0   :  { %840 = vmatmul.mubr.bf16.vlgmr.msra.gmra.mxu1 %v670_v62 }
 0x360   :  { %v988_v63 = vpop.f32.mrf.mxu1 }
 0x362   :  { %v989_v3 = vpop.f32.mrf.mxu1 }
 0x363   :  { %v990_v4 = vadd.f32 %v989_v3, %v988_v63 }
 0x364   :  { %v991_v5 = vpop.f32.mrf.mxu1 }
 0x365   :  { %v842_v6 = vadd.f32 %v990_v4, %v955_v2 }
 0x366   :  { %v992_v7 = vpop.f32.mrf.mxu1 }
 0x367   :  { %v853_v8 = vsel %vm849_vm1, %v842_v6, -inf  ;;  %v857_v11 = vsel %vm1362_vm4, %v842_v6, 0.0 }
 0x368   :  { %854 = vmax.xlane.f32.xlu0 %v853_v8 }
 0x3f1   :  { %v855_v0 = vpop.xlane.xlu0 %854 }
 0x3f2   :  { %v856_v10 = vsub.f32 %v842_v6, %v855_v0 }
 0x3f4   :  { %v858_v12 = vsel %vm849_vm1, %v856_v10, %v857_v11 }
 0x3f5   :  { %v859_v13 = vmul.f32 1.442695, %v858_v12 }
 0x3f7   :  { %1120 = vpow2.f32 %v859_v13 }
 0x404   :  { %v1121_v14 = vpop.eup %1120 }
 0x405   :  { %v861_v15 = vsel %vm849_vm1, %v1121_v14, 0.0  ;;  %v867_v19 = vsel %vm1362_vm4, %v1121_v14, %v842_v6 }
 0x406   :  { %862 = vadd.xlane.f32.xlu0 %v861_v15 }
 0x48f   :  { %v863_v16 = vpop.xlane.xlu0 %862 }
 0x490   :  { %1122 = vrcp.f32 %v863_v16 }
 0x49d   :  { %v1123_v17 = vpop.eup %1122 }
 0x49e   :  { %v866_v18 = vmul.f32 %v1123_v17, %v1121_v14 }
 0x4a0   :  { %v868_v20 = vsel %vm849_vm1, %v866_v18, %v867_v19 }
 0x4a1   :  { %v869_v21 = vpack.c.bf16 %v868_v20, %v868_v20 }
 0x4a3   :  { %870 = vst [vmem:[#allocation11] sm:$0xf] %v869_v21 }
 0x4a4   :  { %1235 = shalt.err (!%p1232_p1)
}
 0x4a5   :  { %880 = dma.vmem_to_hbm [thread:$0]  %s878_s17, 64, %s1385_s9, [#allocation4]  }
 0x4a6   :  { %1250 = dma.done.wait [#allocation4], 64  }
 0x4a7   :  { %1251 = vsyncadd [#allocation4], 4294967232 }
 0x4a8   :  { %884 = vsyncpa [#allocation3], 1 }
 0x4a9   :  { %885 = vsyncpa [#allocation6], 1 }
 0x4aa   :  { %886 = vsyncpa [#allocation9], 1 }
 0x4ab   :  { %887 = vsyncpa [#allocation4], 1 }

</bundles_post_ra>
